<compile_context>
chip_gen: v6e
topology: v6e:2x2x1
jax: 0.10.0
libtpu: 0.0.40
codegen_flags: <defaults>
</compile_context>

<pallas_src>
import functools

import jax
import jax.numpy as jnp
from jax import lax
from jax.experimental import pallas as pl
from jax.experimental.pallas import tpu as pltpu


def _prenorm_kernel(x_ref, w_ref, wb_ref, o_ref, *, eps, nb):
    # x_ref: (nb, C, T)   w_ref: (C, C) [LN-affine folded, x.dtype]
    # wb_ref: (C, 1) f32  o_ref: (nb, C, T)
    w = w_ref[...]
    wb = wb_ref[...]
    for bi in range(nb):                               # static unroll, nb small
        x = x_ref[bi].astype(jnp.float32)              # (C, T) f32 statistics
        mean = jnp.mean(x, axis=0, keepdims=True)      # (1, T)
        # Single-pass variance (unbiased=False); clamp tiny negative residue.
        var = jnp.mean(x * x, axis=0, keepdims=True) - mean * mean
        inv = lax.rsqrt(jnp.maximum(var, 0.0) + eps)   # EUP rsqrt
        xhat = ((x - mean) * inv).astype(w.dtype)      # match MXU operand dtype
        # fn: pointwise 1x1 conv == channel-mixing matmul, f32 accumulation.
        y = jnp.dot(w, xhat, preferred_element_type=jnp.float32) + wb
        o_ref[bi] = y.astype(o_ref.dtype)


def _vmem_budget_bytes():
    """Per-generation VMEM limit for this kernel (with headroom)."""
    try:
        info = pltpu.get_tpu_info()
        cap = int(getattr(info, "vmem_capacity_bytes", 64 * 1024 * 1024))
    except Exception:
        cap = 64 * 1024 * 1024      # v7x floor: smallest per-core VMEM
    # 25% headroom for compiler-internal scratch; hard cap well under 128 MiB.
    return min(cap * 3 // 4, 96 * 1024 * 1024)


def _pick_tiles(n, c, hw_p, x_itemsize, w_itemsize, vmem_limit):
    """Choose (nb, tile_hw): images per grid step and lane-dense spatial tile.

    Per-step VMEM footprint accounted:
      4 * nb*c*t*x_itemsize     in+out DMA buffers, double-buffered
      3 * nb*c*t*4              f32 temporaries (x, xhat, matmul result)
      2 * (c*c*w_itemsize+c*4)  double-buffered resident weight operands
    """
    # TODO(synk): pipeline_mode=pl.Buffered(1) on the constant-index weight
    # specs would halve their footprint; kept at the default 2 buffers here
    # and charged to the budget instead.
    weight_bytes = 2 * (c * c * w_itemsize + c * 4)
    col_bytes = 4 * c * x_itemsize + 3 * c * 4          # per (image x column)
    avail = vmem_limit - 2 * 1024 * 1024 - weight_bytes
    max_cols = max(avail // col_bytes, 128)

    t_cands = [t for t in range(hw_p, 127, -128) if hw_p % t == 0]  # descending
    nb_cands = [d for d in range(1, n + 1) if n % d == 0]           # ascending

    # Largest lane-dense spatial tile that fits with one image per step.
    tile_hw = next((t for t in t_cands if t <= max_cols), 128)

    # Grow the batch block until per-step traffic reaches ~2 MiB / direction.
    target_cols = max((2 * 1024 * 1024) // max(c * x_itemsize, 1), 128)
    nb = 1
    for d in nb_cands:
        if d * tile_hw > max_cols:
            break
        nb = d
        if d * tile_hw >= target_cols:
            break

    # Keep >= 2 grid steps when the input allows it (v7x has 2 TensorCores).
    if (n // nb) * (hw_p // tile_hw) < 2:
        smaller_nb = [d for d in nb_cands if d < nb]
        smaller_t = [t for t in t_cands if t < tile_hw]
        if smaller_nb:
            nb = smaller_nb[-1]
        elif smaller_t:
            tile_hw = smaller_t[0]
    return nb, tile_hw


def prenorm_pallas(x_nchw, g, b, w, wb, eps=1e-5):
    """x_nchw: (N, C, H, W); g, b: (1, C, 1, 1); w: (C, C); wb: (C,)."""
    N, C, H, W = x_nchw.shape
    HW = H * W
    hw_p = ((HW + 127) // 128) * 128

    x = x_nchw.reshape(N, C, HW)                 # native dtype, no host cast
    if hw_p != HW:
        # Pad the flattened spatial axis so every tile stays lane-dense; the
        # zero columns normalize to zero (var=0 -> rsqrt(eps)) and are sliced
        # off below, so no masking is needed in the kernel.
        x = jnp.pad(x, ((0, 0), (0, 0), (0, hw_p - HW)))

    # Fold the LayerNorm affine into the 1x1-conv weights (host side, tiny):
    #   W @ (xhat * g + b) + wb == (W * g^T) @ xhat + (W @ b + wb)
    # TODO(synk): folding is only valid because fn is a linear 1x1 conv; keep
    # g/b separate in-kernel if fn is swapped for a nonlinear module.
    g_vec = g.reshape(C).astype(jnp.float32)
    b_vec = b.reshape(C).astype(jnp.float32)
    w_f32 = w.astype(jnp.float32)
    w_fold = (w_f32 * g_vec[None, :]).astype(x.dtype)                 # (C, C)
    wb_fold = (w_f32 @ b_vec + wb.astype(jnp.float32)).reshape(C, 1)  # (C, 1) f32

    vmem_limit = _vmem_budget_bytes()
    nb, tile_hw = _pick_tiles(N, C, hw_p, x.dtype.itemsize,
                              w_fold.dtype.itemsize, vmem_limit)
    grid = (N // nb, hw_p // tile_hw)

    kernel = functools.partial(_prenorm_kernel, eps=eps, nb=nb)

    out = pl.pallas_call(
        kernel,
        out_shape=jax.ShapeDtypeStruct((N, C, hw_p), x.dtype),
        grid_spec=pltpu.PrefetchScalarGridSpec(
            num_scalar_prefetch=0,
            grid=grid,
            in_specs=[
                pl.BlockSpec((nb, C, tile_hw), lambda ni, si: (ni, 0, si)),
                pl.BlockSpec((C, C), lambda ni, si: (0, 0)),   # VMEM-resident
                pl.BlockSpec((C, 1), lambda ni, si: (0, 0)),   # VMEM-resident
            ],
            out_specs=pl.BlockSpec((nb, C, tile_hw), lambda ni, si: (ni, 0, si)),
        ),
        compiler_params=pltpu.CompilerParams(
            dimension_semantics=("parallel", "parallel"),
            vmem_limit_bytes=int(vmem_limit)),
    )(x, w_fold, wb_fold)

    if hw_p != HW:
        out = out[:, :, :HW]
    return out.reshape(N, C, H, W)


def prenorm_reference(x, g, b, w, wb, eps=1e-5):
    # Pure-JAX reference matching the PyTorch forward.
    mean = jnp.mean(x, axis=1, keepdims=True)
    var = jnp.mean((x - mean) ** 2, axis=1, keepdims=True)
    xn = (x - mean) / jnp.sqrt(var + eps) * g + b
    y = jnp.einsum('oc,nchw->nohw', w, xn) + wb.reshape(1, -1, 1, 1)
    return y


if __name__ == "__main__":
    N, C, H, W = 2, 4, 16, 16
    key = jax.random.PRNGKey(0)
    kx, kg, kb, kw, kwb = jax.random.split(key, 5)

    x = jax.random.normal(kx, (N, C, H, W), dtype=jnp.float32)

    # LayerNorm params: PyTorch init is ones / zeros; perturb deterministically
    # so the affine path is exercised.
    g = jnp.ones((1, C, 1, 1), jnp.float32) + 0.1 * jax.random.normal(kg, (1, C, 1, 1))
    b = jnp.zeros((1, C, 1, 1), jnp.float32) + 0.1 * jax.random.normal(kb, (1, C, 1, 1))

    # fn = pointwise Conv2d(C, C, 1) with deterministic weights.
    w = 0.1 * jax.random.normal(kw, (C, C), dtype=jnp.float32)
    wb = 0.1 * jax.random.normal(kwb, (C,), dtype=jnp.float32)

    out = prenorm_pallas(x, g, b, w, wb)
    out = jax.block_until_ready(out)

    ref = prenorm_reference(x, g, b, w, wb)
    assert jnp.allclose(out, ref, atol=1e-4, rtol=1e-4), "mismatch vs reference"

    print("KERNEL_OK")
</pallas_src>

<mosaic_0001>
module attributes {stable_mosaic.version = 11 : i64} {
  func.func @_prenorm_kernel(%arg0: i32, %arg1: i32, %arg2: memref<1x4x256xf32, #tpu.memory_space<vmem>>, %arg3: memref<4x4xf32, #tpu.memory_space<vmem>>, %arg4: memref<4x1xf32, #tpu.memory_space<vmem>>, %arg5: memref<1x4x256xf32, #tpu.memory_space<vmem>>) attributes {dimension_semantics = [#tpu.dimension_semantics<parallel>, #tpu.dimension_semantics<parallel>], iteration_bounds = array<i64: 2, 1>, scalar_prefetch = 0 : i64, scratch_operands = 0 : i64, tpu.core_type = #tpu.core_type<tc>, window_params = [{transform_indices = @transform_0, window_bounds = array<i64: 1, 4, 256>}, {pipeline_mode = #tpu.pipeline_mode<synchronous>, transform_indices = @transform_1, window_bounds = array<i64: 4, 4>}, {pipeline_mode = #tpu.pipeline_mode<synchronous>, transform_indices = @transform_2, window_bounds = array<i64: 4, 1>}, {transform_indices = @transform_3, window_bounds = array<i64: 1, 4, 256>}]} {
    %c0 = arith.constant 0 : index
    %c0_0 = arith.constant 0 : index
    %0 = vector.load %arg3[%c0, %c0_0] : memref<4x4xf32, #tpu.memory_space<vmem>>, vector<4x4xf32>
    %c0_1 = arith.constant 0 : index
    %c0_2 = arith.constant 0 : index
    %1 = vector.load %arg4[%c0_1, %c0_2] : memref<4x1xf32, #tpu.memory_space<vmem>>, vector<4x1xf32>
    %c0_3 = arith.constant 0 : index
    %c0_4 = arith.constant 0 : index
    %c0_5 = arith.constant 0 : index
    %2 = vector.load %arg2[%c0_3, %c0_4, %c0_5] : memref<1x4x256xf32, #tpu.memory_space<vmem>>, vector<1x4x256xf32>
    %3 = vector.shape_cast %2 : vector<1x4x256xf32> to vector<4x256xf32>
    %cst = arith.constant dense<0.000000e+00> : vector<256xf32>
    %4 = vector.multi_reduction <add>, %3, %cst [0] : vector<4x256xf32> to vector<256xf32>
    %5 = vector.shape_cast %4 : vector<256xf32> to vector<1x256xf32>
    %cst_6 = arith.constant 4.000000e+00 : f32
    %6 = vector.broadcast %cst_6 : f32 to vector<1x256xf32>
    %7 = arith.divf %5, %6 : vector<1x256xf32>
    %8 = arith.mulf %3, %3 : vector<4x256xf32>
    %cst_7 = arith.constant dense<0.000000e+00> : vector<256xf32>
    %9 = vector.multi_reduction <add>, %8, %cst_7 [0] : vector<4x256xf32> to vector<256xf32>
    %10 = vector.shape_cast %9 : vector<256xf32> to vector<1x256xf32>
    %cst_8 = arith.constant 4.000000e+00 : f32
    %11 = vector.broadcast %cst_8 : f32 to vector<1x256xf32>
    %12 = arith.divf %10, %11 : vector<1x256xf32>
    %13 = arith.mulf %7, %7 : vector<1x256xf32>
    %14 = arith.subf %12, %13 : vector<1x256xf32>
    %cst_9 = arith.constant 0.000000e+00 : f32
    %15 = vector.broadcast %cst_9 : f32 to vector<1x256xf32>
    %16 = arith.maximumf %14, %15 : vector<1x256xf32>
    %cst_10 = arith.constant 9.99999974E-6 : f32
    %17 = vector.broadcast %cst_10 : f32 to vector<1x256xf32>
    %18 = arith.addf %16, %17 : vector<1x256xf32>
    %19 = math.rsqrt %18 : vector<1x256xf32>
    %20 = vector.broadcast %7 : vector<1x256xf32> to vector<4x256xf32>
    %21 = arith.subf %3, %20 : vector<4x256xf32>
    %22 = vector.broadcast %19 : vector<1x256xf32> to vector<4x256xf32>
    %23 = arith.mulf %21, %22 : vector<4x256xf32>
    %cst_11 = arith.constant dense<0.000000e+00> : vector<4x256xf32>
    %24 = tpu.matmul %0, %23, %cst_11 {dimension_numbers = #tpu.dot_dimension_numbers<[1], [0], [0], [1], [0, 0, 1, 1], [], []>} : vector<4x4xf32>, vector<4x256xf32>, vector<4x256xf32> -> vector<4x256xf32>
    %25 = vector.broadcast %1 : vector<4x1xf32> to vector<4x256xf32>
    %26 = arith.addf %24, %25 : vector<4x256xf32>
    %c0_12 = arith.constant 0 : index
    %c0_13 = arith.constant 0 : index
    %c0_14 = arith.constant 0 : index
    %27 = vector.load %arg5[%c0_12, %c0_13, %c0_14] : memref<1x4x256xf32, #tpu.memory_space<vmem>>, vector<1x4x256xf32>
    %28 = vector.shape_cast %27 : vector<1x4x256xf32> to vector<4x256xf32>
    %29 = vector.shape_cast %26 : vector<4x256xf32> to vector<1x4x256xf32>
    tpu.vector_store %arg5[%c0_12, %c0_13, %c0_14], %29 {strides = array<i32>} : memref<1x4x256xf32, #tpu.memory_space<vmem>>, vector<1x4x256xf32>,
    return
  }
  func.func @transform_0(%arg0: i32, %arg1: i32) -> (i32, i32, i32) {
    %c0_i32 = arith.constant 0 : i32
    %c0_i32_0 = arith.constant 0 : i32
    return %arg0, %c0_i32, %arg1 : i32, i32, i32
  }
  func.func @transform_1(%arg0: i32, %arg1: i32) -> (i32, i32) {
    %c0_i32 = arith.constant 0 : i32
    %c0_i32_0 = arith.constant 0 : i32
    %c0_i32_1 = arith.constant 0 : i32
    return %c0_i32, %c0_i32_0 : i32, i32
  }
  func.func @transform_2(%arg0: i32, %arg1: i32) -> (i32, i32) {
    %c0_i32 = arith.constant 0 : i32
    %c0_i32_0 = arith.constant 0 : i32
    %c0_i32_1 = arith.constant 0 : i32
    return %c0_i32, %c0_i32_0 : i32, i32
  }
  func.func @transform_3(%arg0: i32, %arg1: i32) -> (i32, i32, i32) {
    %c0_i32 = arith.constant 0 : i32
    %c0_i32_0 = arith.constant 0 : i32
    return %arg0, %c0_i32, %arg1 : i32, i32, i32
  }
}

</mosaic_0001>

<bundles_post_ra>
// kernel: tpu_custom_call.1
= control target key start
LH: loop header
LB: loop body
LE: loop exit
PB: predicated region body
PF: predicated region fallthrough
CT: control target
= control target key end

     0   :  { %8 = vsyncpa [#allocation3], 0  ;;  %s837_s0 = inlined_call_operand.hbm [shape: f32[2,4,256], index: 0, kind: input, shape index: {}]   ;;  %s838_s1 = inlined_call_operand.vmem [shape: f32[4,4], index: 1, kind: input, shape index: {}]   ;;  %s839_s2 = inlined_call_operand.vmem [shape: f32[4,1], index: 2, kind: input, shape index: {}]   ;;  %s840_s3 = inlined_call_operand.hbm [shape: f32[2,4,256], index: 3, kind: output, shape index: {}]  }
   0x1   :  { %10 = vsyncpa [#allocation3 + $0x1], 0 }
   0x2   :  { %11 = vsyncpa [#allocation4], 0 }
   0x3   :  { %13 = vsyncpa [#allocation4 + $0x1], 0  ;;  %s687_s12 = smov 0   ;;  %s689_s13 = smov 0  }
   0x4   :  { %s691_s14 = smov 0   ;;  %s693_s15 = smov 0  }
   0x5   :  { %s695_s16 = smov 0   ;;  %s697_s17 = smov 0  }
   0x6 LB: > { %s463_s18 = sadd.s32 4294967295, %s661_s17   ;;  %s464_s19 = sadd.s32 4294967294, %s661_s17   ;;  %s661_s17 = sphi %s697_s17, %s19_s17   ;;  %s657_s16 = sphi %s695_s16, %s852_s16   ;;  %s653_s15 = sphi %s693_s15, %s851_s15   ;;  %s649_s14 = sphi %s691_s14, %s850_s14   ;;  %s645_s13 = sphi %s689_s13, %s849_s13   ;;  %s641_s12 = sphi %s687_s12, %s848_s12  }
   0x7   : > { %s31_s20 = sadd.s32 1, %s657_s16  ;;  %s40_s21 = sadd.s32 1, %s649_s14 }
   0x8   : > { %p33_p0 = scmp.ge.s32.totalorder %s31_s20, 2  ;;  %p47_p1 = scmp.ne.s32.totalorder %s649_s14, %s645_s13 }
   0x9   : > { %p48_p2 = scmp.eq.s32.totalorder %s661_s17, 0  ;;  %p53_p3 = scmp.ne.s32.totalorder %s645_s13, %s641_s12 }
   0xa   : > { %s854_s20 = smov (%p33_p0, %s31_s20), 0  ;;  %p54_p5 = scmp.eq.s32.totalorder %s463_s18, 0 }
   0xb   : > { %p728_p4 = por %p48_p2, %p47_p1  ;;  %s35_s23 = ssub.s32 %s657_s16, %s854_s20 }
   0xc   : > { %p121_p6 = scmp.eq.s32.totalorder %s463_s18, 1  ;;  %p38_p7 = scmp.eq.s32.totalorder %s35_s23, 0 }
   0xd   : > { %p734_p8 = por %p54_p5, %p53_p3  ;;  %p127_p10 = scmp.eq.s32.totalorder %s464_s19, 1 }
   0xe   : > { %p738_p9 = por %p121_p6, %p47_p1  ;;  %p495_p13 = scmp.lt.s32.totalorder %s661_s17, 2 }
   0xf   : > { %s743_s26 = scalar_select %p38_p7, %s649_s14, %s40_s21  }
  0x10   : > { %p745_p11 = por %p127_p10, %p53_p3  ;;  %s153_s28 = sand.u32 1, %s649_s14  }
  0x11   : > { %s467_s29 = sshll.u32 %s153_s28, 3  ;;  %s481_s30 = sshll.u32 %s657_s16, 7 }
  0x12   : > { %s844_s27 = scalar_select %p745_p11, 1, 0 }
  0x13   : > { %s165_s6 = scalar_lea.hbm %s837_s0, %s481_s30  ;;  %s157_s7 = scalar_lea.vmem [#allocation2], %s467_s29 }
  0x14   : > { %s167_s8 = sshll.u32 %s157_s7, 4  ;;  %p758_p0 = pnand %p495_p13, %p728_p4  ;;  %s168_s8 = int_to_ptr.vmem [resolvable:$true] %s167_s8 }
  0x15   : > { %p470_p1 = scmp.ge.s32.totalorder %s661_s17, 1  ;;  %p172_p2 = scmp.lt.s32.totalorder %s661_s17, 3 }
  0x16   : > { %s154_s10 = scalar_lea.sflag [#allocation3], %s153_s28  ;;  %p555_p3 = pneg %p758_p0 }
  0x17   : > { %s566_s11 = scalar_lea.vmem %s168_s8, 128  ;;  %s663_s18 = smov [#allocation2]  }
  0x18   : > { %p567_p5 = scmp.ne.s32.totalorder %s168_s8, %s566_s11  ;;  %s571_s19 = sshll.u32 %s663_s18, 4  ;;  %s572_s19 = int_to_ptr.vmem [resolvable:$false] %s571_s19 }
  0x19   : > { %s573_s21 = scalar_lea.vmem %s572_s19, 256  ;;  %p574_p10 = scmp.lt.s32.totalorder %s168_s8, %s572_s19 }
  0x1a   : > { %p569_p6 = pnand %p567_p5, %p555_p3  ;;  %p575_p12 = scmp.lt.s32.totalorder %s573_s21, %s566_s11 }
  0x1c   : > { %p570_p7 = pneg %p569_p6  ;;  %p576_p4 = por %p575_p12, %p574_p10 }
  0x1e   : > { %p577_p13 = pnand %p576_p4, %p570_p7 }
  0x20   : > { %580 = shalt.err (!%p577_p13)
}
  0x21   : > { %490 = dma.hbm_to_vmem [thread:$0]  (!%p758_p0), %s165_s6, 128, %s168_s8, %s154_s10  }
  0x22   : > { %p173_p11 = pnand %p470_p1, %p172_p2 }
  0x23   : > { %s773_s22 = sand.u32 (!%p173_p11), 1, %s645_s13  }
  0x24   : > { %176 = sbr.rel (%p173_p11) target bundleno = 302 (0x12e), region = 32  ;;  %s471_s23 = sshll.u32 (!%p173_p11), %s773_s22, 3 }
  0x25   : > { %s179_s28 = scalar_lea.sflag (!%p173_p11), [#allocation3], %s773_s22  ;;  %s182_s29 = scalar_lea.vmem (!%p173_p11), [#allocation2], %s471_s23 }
  0x29   : > { %632 = dma.done.wait (%p734_p8), %s179_s28, 128  }
  0x2a   : > { %634 = vsyncadd (%p734_p8), %s179_s28, 4294967168  ;;  %v664_v0 = vmov 0.0   ;;  %v665_v1 = vmov 0   ;;  %vm213_vm0 = vcmask 1043456   ;;  %v209_v2 = vld [vmem:[%s182_s29] sm:$0xff]  ;;  %vm278_vm1 = vcmask 31744  }
  0x2b   : > { %350 = vmatprep.mubr.f32.mxu0 %v664_v0  ;;  %547 = vset.pattern.permute.xlu0 %v665_v1  ;;  %v208_v3 = vld [vmem:[%s839_s2] sm:$0xf]  ;;  %v211_v4 = vcombine.high %v209_v2, %v209_v2  ;;  %v214_v5 = vsel %vm213_vm0, %v209_v2, 0.0  ;;  %v231_v6 = vmul.f32 %v209_v2, %v209_v2  ;;  %s482_s6 = sshll.u32 %s653_s15, 7  ;;  %s204_s7 = scalar_lea.vmem [#allocation5], %s471_s23 }
  0x2c   : > { %273 = vperm.xlu0 %547, %v208_v3   ;;  %v215_v7 = vrot.slane %v214_v5, 4  ;;  %v207_v54 = vld [vmem:[%s838_s1] sm:$0xf]  ;;  %s379_s8 = sshll.u32 %s204_s7, 4  ;;  %s377_s11 = scalar_lea.hbm %s840_s3, %s482_s6  ;;  %s380_s8 = int_to_ptr.vmem [resolvable:$true] %s379_s8 }
  0x2d   : > { %v221_v8 = vsel %vm213_vm0, %v211_v4, 0.0  ;;  %v233_v9 = vcombine.high %v231_v6, %v231_v6  ;;  %v235_v10 = vsel %vm213_vm0, %v231_v6, 0.0  ;;  %s363_s18 = scalar_lea.sflag [#allocation4], %s773_s22  ;;  %s581_s19 = scalar_lea.vmem %s380_s8, 128 }
  0x2e   : > { %v216_v11 = vadd.f32 %v215_v7, %v214_v5  ;;  %v222_v12 = vrot.slane %v221_v8, 4  ;;  %v236_v13 = vrot.slane %v235_v10, 4  ;;  %p582_p8 = scmp.ne.s32.totalorder %s380_s8, %s581_s19  ;;  %s666_s21 = smov [#allocation5]  }
  0x2f   : > { %v242_v14 = vsel %vm213_vm0, %v233_v9, 0.0  ;;  %s585_s15 = sshll.u32 %s666_s21, 4  ;;  %s586_s15 = int_to_ptr.vmem [resolvable:$false] %s585_s15 }
  0x30   : > { %v217_v15 = vrot.slane %v216_v11, 2  ;;  %v223_v16 = vadd.f32 %v222_v12, %v221_v8  ;;  %v237_v17 = vadd.f32 %v236_v13, %v235_v10  ;;  %v243_v18 = vrot.slane %v242_v14, 4  ;;  %p583_p11 = pnand %p582_p8, %p738_p9  ;;  %s587_s23 = scalar_lea.vmem %s586_s15, 256 }
  0x31   : > { %p588_p0 = scmp.lt.s32.totalorder %s380_s8, %s586_s15  ;;  %p589_p1 = scmp.lt.s32.totalorder %s587_s23, %s581_s19 }
  0x32   : > { %v218_v19 = vadd.f32 %v217_v15, %v216_v11  ;;  %v224_v20 = vrot.slane %v223_v16, 2  ;;  %v238_v21 = vrot.slane %v237_v17, 2  ;;  %v244_v22 = vadd.f32 %v243_v18, %v242_v14  ;;  %p584_p12 = pneg %p583_p11 }
  0x33   : > { %p590_p2 = por %p589_p1, %p588_p0 }
  0x34   : > { %v219_v23 = vrot.slane %v218_v19, 1  ;;  %v225_v24 = vadd.f32 %v224_v20, %v223_v16  ;;  %v239_v25 = vadd.f32 %v238_v21, %v237_v17  ;;  %v245_v26 = vrot.slane %v244_v22, 2 }
  0x35   : > { %p591_p3 = pnand %p590_p2, %p584_p12 }
  0x36   : > { %v220_v27 = vadd.f32 %v219_v23, %v218_v19  ;;  %v226_v28 = vrot.slane %v225_v24, 1  ;;  %v240_v29 = vrot.slane %v239_v25, 1  ;;  %v246_v30 = vadd.f32 %v245_v26, %v244_v22 }
  0x38   : > { %v227_v31 = vadd.f32 %v226_v28, %v225_v24  ;;  %v229_v32 = vmul.f32 0.25, %v220_v27  ;;  %v241_v33 = vadd.f32 %v240_v29, %v239_v25  ;;  %v247_v34 = vrot.slane %v246_v30, 1 }
  0x3a   : > { %v230_v35 = vmul.f32 0.25, %v227_v31  ;;  %v248_v36 = vadd.f32 %v247_v34, %v246_v30  ;;  %v249_v37 = vmul.f32 0.25, %v241_v33  ;;  %v251_v38 = vmul.f32 %v229_v32, %v229_v32 }
  0x3c   : > { %v250_v39 = vmul.f32 0.25, %v248_v36  ;;  %v252_v40 = vmul.f32 %v230_v35, %v230_v35  ;;  %v253_v41 = vsub.f32 %v249_v37, %v251_v38  ;;  %v263_v47 = vcombine.low %v229_v32, %v230_v35 }
  0x3e   : > { %v254_v42 = vsub.f32 %v250_v39, %v252_v40  ;;  %v255_v43 = vmax.f32 %v253_v41, 0.0  ;;  %v265_v49 = vsub.f32 %v209_v2, %v263_v47 }
  0x40   : > { %v256_v44 = vmax.f32 %v254_v42, 0.0  ;;  %v257_v45 = vadd.f32 1e-05, %v255_v43 }
  0x42   : > { %v258_v46 = vadd.f32 1e-05, %v256_v44  ;;  %549 = vrsqrt.f32 %v257_v45 }
  0x44   : > { %551 = vrsqrt.f32 %v258_v46 }
  0x4f   : > { %v550_v48 = vpop.eup %549 }
  0x51   : > { %v552_v50 = vpop.eup %551 }
  0x52   : > { %v268_v51 = vcombine.low %v550_v48, %v552_v50 }
  0x54   : > { %v270_v52 = vmul.f32 %v268_v51, %v265_v49 }
  0x56   : > { %v277_v53 = vcombine.high %v270_v52, %v270_v52 }
  0x58   : > { %473 = vmatprep.subr.msk.mxu0 %vm213_vm0, %v277_v53 }
  0x59   : > { %474 = vmatpush1.msk.msra.mxu0 %vm213_vm0, %v270_v52 }
  0x5a   : > { %475 = vmatmul.mubr.msk.f32.vlgmr.msra.gmra.mxu0 %vm278_vm1, %v207_v54 }
  0xa7   : > { %v274_v55 = vpop.permute.xlu0 %273 }
 0x11a   : > { %v352_v56 = vpop.f32.mrf.mxu0 }
 0x11b   : > { %v353_v58 = vadd.f32 %v352_v56, %v274_v55 }
 0x11c   : > { %v354_v57 = vpop.f32.mrf.mxu0 }
 0x11d   : > { %v355_v59 = vadd.f32 %v354_v57, %v274_v55 }
 0x11f   : > { %v359_v60 = vcombine.low %v353_v58, %v355_v59 }
 0x121   : > { %361 = vst [vmem:[%s204_s7] sm:$0xff] %v359_v60 }
 0x122   : > { %594 = shalt.err (!%p591_p3)
}
 0x123   : > { %s595_s28 = scalar_lea.hbm %s377_s11, 128  ;;  %s599_s30 = scalar_lea.hbm %s840_s3, 256 }
 0x124   : > { %p596_p5 = scmp.ne.s32.totalorder %s377_s11, %s595_s28  ;;  %p600_p10 = scmp.lt.s32.totalorder %s377_s11, %s840_s3 }
 0x125   : > { %p601_p4 = scmp.lt.s32.totalorder %s599_s30, %s595_s28 }
 0x126   : > { %p597_p6 = pnand %p596_p5, %p738_p9 }
 0x127   : > { %p602_p13 = por %p601_p4, %p600_p10 }
 0x128   : > { %p598_p7 = pneg %p597_p6 }
 0x12a   : > { %p603_p8 = pnand %p602_p13, %p598_p7 }
 0x12c   : > { %606 = shalt.err (!%p603_p8)
}
 0x12d   : > { %485 = dma.vmem_to_hbm [thread:$0]  (%p738_p9), %s380_s8, 128, %s377_s11, %s363_s18  }
 0x12e PF: > { %s391_s5 = sand.u32 1, %s641_s12   ;;  %p846_p11 = scmp.ne.s32.totalorder %s844_s27, 0 }
 0x12f   : > { %p847_p12 = scmp.ge.s32.totalorder %s661_s17, 2  ;;  %s392_s6 = scalar_lea.sflag [#allocation4], %s391_s5 }
 0x131   : > { %p492_p0 = pnand %p847_p12, %p846_p11 }
 0x133   : > { %p493_p1 = pneg %p492_p0 }
 0x135   : > { %636 = dma.done.wait (%p493_p1), %s392_s6, 128  }
 0x136   : > { %638 = vsyncadd (%p493_p1), %s392_s6, 4294967168  ;;  %s19_s17 = sadd.s32 1, %s661_s17   ;;  %s848_s12 = smov %s645_s13 }
 0x137   : > { %p16_p2 = scmp.ge.s32.totalorder %s19_s17, 4   ;;  %s849_s13 = smov %s649_s14 }
 0x138   : > { %s850_s14 = smov %s743_s26  ;;  %s851_s15 = smov %s657_s16 }
 0x139   : > { %s852_s16 = smov %s854_s20  ;;  %18 = sbr.rel (!%p16_p2) target bundleno = 6 (0x6), region = 77 }
 0x13e   :  { %397 = vsyncpa [#allocation3], 1 }
 0x13f   :  { %399 = vsyncpa [#allocation3 + $0x1], 1 }
 0x140   :  { %400 = vsyncpa [#allocation4], 1 }
 0x141   :  { %402 = vsyncpa [#allocation4 + $0x1], 1 }

</bundles_post_ra>
